<compile_context>
chip_gen: v7x
topology: tpu7x:2x2x1
jax: 0.10.0
libtpu: 0.0.40
codegen_flags: <defaults>
</compile_context>

<pallas_src>
import functools
import jax
import jax.numpy as jnp
from jax.experimental import pallas as pl
from jax.experimental.pallas import tpu as pltpu


def _convbank_kernel(max_k, max_pad, halo8, t_orig, t_tile,
                     x_ref, xl_ref, xr_ref, in_w_ref, in_b_ref,
                     taps_ref, cb_ref, ow_ref, ob_ref, o_ref,
                     hp_ref, acc_ref):
    """One (batch item, time tile) step.

    refs:
      x_ref  : (1, T_TILE, D_in)   current time tile of the input (f32)
      xl_ref : (1, HALO8,  D_in)   HALO8 rows just before the tile (clamped)
      xr_ref : (1, HALO8,  D_in)   HALO8 rows just after the tile (clamped)
      in_w_ref : (D_in, H) bf16,  in_b_ref : (1, H) f32
      taps_ref : (max_k, H, C*nk) bf16   per-tap-offset fused conv weights
      cb_ref   : (1, C*nk) f32           fused conv bias
      ow_ref   : (C*nk, n_out_pad) bf16  out_linear weight (lane-padded)
      ob_ref   : (1, n_out_pad) f32      out_linear bias   (lane-padded)
      o_ref    : (1, T_TILE, n_out_pad)
      hp_ref   : VMEM (T_TILE + 2*HALO8, H) f32   halo-padded hidden scratch
      acc_ref  : VMEM (T_TILE, C*nk) f32          conv-bank accumulator
    """
    t = pl.program_id(1)
    row0 = t * t_tile                      # global index of first body row

    # ---- staged hidden: one matmul, one mask, one aligned store -------------
    # Global rows covered: [row0 - HALO8, row0 + T_TILE + HALO8)  (contiguous).
    x_all = jnp.concatenate([xl_ref[0], x_ref[0], xr_ref[0]], axis=0)
    h = jnp.dot(x_all.astype(jnp.bfloat16), in_w_ref[...],
                preferred_element_type=jnp.float32) + in_b_ref[...]
    h = jnp.maximum(h, 0.0)
    # Rows outside the real sequence [0, t_orig) are zeroed: this emulates both
    # Conv1d zero padding at the edges and any time padding up to T_pad.
    rows = (row0 - halo8) + jax.lax.broadcasted_iota(jnp.int32, h.shape, 0)
    h = jnp.where((rows >= 0) & (rows < t_orig), h, 0.0)
    hp_ref[...] = h                        # single, fully 8-aligned store

    # ---- conv bank: max_k fused (T_TILE, H) x (H, C*nk) matmuls -------------
    base = halo8 - max_pad                 # centre tap (j = max_pad) is aligned
    acc_ref[...] = jnp.dot(hp_ref[base:base + t_tile, :].astype(jnp.bfloat16),
                           taps_ref[0], preferred_element_type=jnp.float32)
    for j in range(1, max_k):              # static unroll over tap offsets
        acc_ref[...] += jnp.dot(
            hp_ref[base + j:base + j + t_tile, :].astype(jnp.bfloat16),
            taps_ref[j], preferred_element_type=jnp.float32)
    conv = jnp.maximum(acc_ref[...] + cb_ref[...], 0.0)      # (T_TILE, C*nk)

    # ---- out_linear into a lane-dense (128-padded) block --------------------
    out = jnp.dot(conv.astype(jnp.bfloat16), ow_ref[...],
                  preferred_element_type=jnp.float32) + ob_ref[...]
    o_ref[0] = out.astype(o_ref.dtype)


def convbank_forward(features, params, kernels, cnn_size, *, t_tile_cap=1024):
    # Even kernel sizes change the output length in PyTorch (T+1); not handled.
    assert all(k % 2 == 1 for k in kernels), "only odd kernel sizes supported"

    B, T, D_in = features.shape
    in_w, in_b = params["in_w"], params["in_b"]
    out_w, out_b = params["out_w"], params["out_b"]
    H = in_w.shape[1]
    n_out = out_w.shape[1]
    nk = len(kernels)
    C = cnn_size
    Ctot = C * nk
    max_k = max(kernels)
    max_pad = max_k // 2

    def round_up(a, m):
        return (a + m - 1) // m * m

    # ---- time tiling ----
    HALO8 = round_up(max(max_pad, 1), 8)   # sublane-aligned halo rows per side
    T_TILE = min(round_up(t_tile_cap, HALO8), round_up(T, HALO8))
    # Keep both v7x TensorCores busy when the parallel grid would be a single step.
    if B == 1 and round_up(T, T_TILE) == T_TILE and T_TILE >= 2 * HALO8:
        T_TILE = round_up(T_TILE // 2, HALO8)
    assert T_TILE % HALO8 == 0, "tile must be a multiple of the halo block"
    T_pad = round_up(T, T_TILE)
    nT = T_pad // T_TILE
    nTb = T_TILE // HALO8                  # halo blocks per tile
    nBh = T_pad // HALO8                   # halo blocks along padded time axis
    x = features
    if T_pad != T:
        x = jnp.pad(features, ((0, 0), (0, T_pad - T), (0, 0)))

    # ---- fused per-tap-offset conv weights: (max_k, H, C*nk), bf16 operands ----
    taps = jnp.zeros((max_k, H, Ctot), jnp.float32)
    for i, k in enumerate(kernels):
        s = max_pad - k // 2
        taps = taps.at[s:s + k, :, i * C:(i + 1) * C].set(params[f"conv_w_{i}"])
    taps_bf = taps.astype(jnp.bfloat16)
    cb_all = jnp.concatenate(
        [params[f"conv_b_{i}"] for i in range(nk)], axis=-1)     # (1, C*nk) f32
    in_w_bf = in_w.astype(jnp.bfloat16)

    # ---- lane-dense (128-padded) output projection ----
    n_out_pad = round_up(n_out, 128)
    out_w_p = jnp.pad(out_w, ((0, 0), (0, n_out_pad - n_out))).astype(jnp.bfloat16)
    out_b_p = jnp.pad(out_b, ((0, 0), (0, n_out_pad - n_out)))

    # ---- VMEM budget derived from the actual buffers (x2 for double-buffering,
    #      x4 headroom for Mosaic temporaries) ----
    weight_bytes = (in_w_bf.size * 2 + in_b.size * 4 + taps_bf.size * 2 +
                    cb_all.size * 4 + out_w_p.size * 2 + out_b_p.size * 4)
    est = 2 * (T_TILE * D_in * 4 + 2 * HALO8 * D_in * 4
               + T_TILE * n_out_pad * 4 + weight_bytes)
    est += (T_TILE + 2 * HALO8) * H * 4 + T_TILE * Ctot * 4      # scratch
    vmem_limit = int(min(64 * 1024 * 1024, max(8 * 1024 * 1024, 4 * est)))

    kernel = functools.partial(_convbank_kernel, max_k, max_pad, HALO8, T, T_TILE)

    out = pl.pallas_call(
        kernel,
        out_shape=jax.ShapeDtypeStruct((B, T_pad, n_out_pad), features.dtype),
        grid_spec=pltpu.PrefetchScalarGridSpec(
            num_scalar_prefetch=0,
            grid=(B, nT),
            in_specs=[
                pl.BlockSpec((1, T_TILE, D_in), lambda b, t: (b, t, 0)),
                # HALO8 rows immediately before / after the tile (clamped;
                # out-of-sequence rows are zeroed in-kernel by the row mask).
                pl.BlockSpec((1, HALO8, D_in),
                             lambda b, t: (b, jnp.maximum(t * nTb - 1, 0), 0)),
                pl.BlockSpec((1, HALO8, D_in),
                             lambda b, t: (b, jnp.minimum((t + 1) * nTb, nBh - 1), 0)),
                pl.BlockSpec(in_w_bf.shape, lambda b, t: (0, 0)),
                pl.BlockSpec(in_b.shape, lambda b, t: (0, 0)),
                pl.BlockSpec(taps_bf.shape, lambda b, t: (0, 0, 0)),
                pl.BlockSpec(cb_all.shape, lambda b, t: (0, 0)),
                pl.BlockSpec(out_w_p.shape, lambda b, t: (0, 0)),
                pl.BlockSpec(out_b_p.shape, lambda b, t: (0, 0)),
            ],
            out_specs=pl.BlockSpec((1, T_TILE, n_out_pad),
                                   lambda b, t: (b, t, 0)),
            scratch_shapes=[
                pltpu.VMEM((T_TILE + 2 * HALO8, H), jnp.float32),
                pltpu.VMEM((T_TILE, Ctot), jnp.float32),
            ],
        ),
        compiler_params=pltpu.CompilerParams(
            dimension_semantics=("parallel", "parallel"),
            vmem_limit_bytes=vmem_limit,
        ),
    )(x, x, x, in_w_bf, in_b, taps_bf, cb_all, out_w_p, out_b_p)

    return out[:, :T, :n_out]


def convbank_reference(features, params, kernels, cnn_size):
    """Plain-JAX f32 reference mirroring the PyTorch forward (dropout=identity)."""
    h = jnp.maximum(features @ params["in_w"] + params["in_b"], 0.0)  # (B,T,H)
    B, T, H = h.shape
    max_pad = max(k // 2 for k in kernels)
    hp = jnp.pad(h, ((0, 0), (max_pad, max_pad), (0, 0)))
    feats = []
    for i, k in enumerate(kernels):
        cw = params[f"conv_w_{i}"]   # (k, H, C)
        cb = params[f"conv_b_{i}"]   # (1, C)
        pad = k // 2
        acc = jnp.zeros((B, T, cnn_size), jnp.float32)
        for j in range(k):
            start = max_pad - pad + j
            acc = acc + jnp.einsum("bth,hc->btc", hp[:, start:start + T, :], cw[j])
        feats.append(acc + cb)
    hidden = jnp.maximum(jnp.concatenate(feats, axis=-1), 0.0)
    return hidden @ params["out_w"] + params["out_b"]


if __name__ == "__main__":
    # Small config consistent with the module's __init__.
    B, T = 2, 16
    input_dim = 8
    hidden_size = 32
    cnn_size = 32
    kernels = (3, 5, 7)
    output_class_num = 10
    # dropout = 0.0 (identity)

    key = jax.random.PRNGKey(0)
    keys = jax.random.split(key, 3 + 2 * len(kernels) + 2)

    params = {
        "in_w": 0.1 * jax.random.normal(keys[0], (input_dim, hidden_size), jnp.float32),
        "in_b": 0.1 * jax.random.normal(keys[1], (1, hidden_size), jnp.float32),
        "out_w": 0.1 * jax.random.normal(
            keys[2], (cnn_size * len(kernels), output_class_num), jnp.float32),
        "out_b": 0.1 * jax.random.normal(keys[3], (1, output_class_num), jnp.float32),
    }
    for i, k in enumerate(kernels):
        params[f"conv_w_{i}"] = 0.1 * jax.random.normal(
            keys[4 + 2 * i], (k, hidden_size, cnn_size), jnp.float32)
        params[f"conv_b_{i}"] = 0.1 * jax.random.normal(
            keys[5 + 2 * i], (1, cnn_size), jnp.float32)

    features = jax.random.normal(keys[-1], (B, T, input_dim), jnp.float32)

    out = convbank_forward(features, params, kernels, cnn_size)
    out = jax.block_until_ready(out)

    ref = convbank_reference(features, params, kernels, cnn_size)
    assert out.shape == (B, T, output_class_num), out.shape
    # Tolerance relaxed vs the fp32 reference because matmul operands are bf16
    # (f32 accumulation); observed error is O(1e-3).
    assert jnp.allclose(out, ref, atol=2e-2, rtol=2e-2), "mismatch vs reference"

    print("KERNEL_OK")
</pallas_src>

<mosaic_0001>
module attributes {stable_mosaic.version = 11 : i64} {
  func.func @_convbank_kernel(%arg0: i32, %arg1: i32, %arg2: memref<1x16x8xf32, #tpu.memory_space<vmem>>, %arg3: memref<1x8x8xf32, #tpu.memory_space<vmem>>, %arg4: memref<1x8x8xf32, #tpu.memory_space<vmem>>, %arg5: memref<8x32xbf16, #tpu.memory_space<vmem>>, %arg6: memref<1x32xf32, #tpu.memory_space<vmem>>, %arg7: memref<7x32x96xbf16, #tpu.memory_space<vmem>>, %arg8: memref<1x96xf32, #tpu.memory_space<vmem>>, %arg9: memref<96x128xbf16, #tpu.memory_space<vmem>>, %arg10: memref<1x128xf32, #tpu.memory_space<vmem>>, %arg11: memref<1x16x128xf32, #tpu.memory_space<vmem>>, %arg12: memref<32x32xf32, #tpu.memory_space<vmem>>, %arg13: memref<16x96xf32, #tpu.memory_space<vmem>>) attributes {dimension_semantics = [#tpu.dimension_semantics<parallel>, #tpu.dimension_semantics<parallel>], iteration_bounds = array<i64: 2, 1>, scalar_prefetch = 0 : i64, scratch_operands = 2 : i64, tpu.core_type = #tpu.core_type<tc>, window_params = [{transform_indices = @transform_0, window_bounds = array<i64: 1, 16, 8>}, {transform_indices = @transform_1, window_bounds = array<i64: 1, 8, 8>}, {transform_indices = @transform_2, window_bounds = array<i64: 1, 8, 8>}, {pipeline_mode = #tpu.pipeline_mode<synchronous>, transform_indices = @transform_3, window_bounds = array<i64: 8, 32>}, {pipeline_mode = #tpu.pipeline_mode<synchronous>, transform_indices = @transform_4, window_bounds = array<i64: 1, 32>}, {pipeline_mode = #tpu.pipeline_mode<synchronous>, transform_indices = @transform_5, window_bounds = array<i64: 7, 32, 96>}, {pipeline_mode = #tpu.pipeline_mode<synchronous>, transform_indices = @transform_6, window_bounds = array<i64: 1, 96>}, {pipeline_mode = #tpu.pipeline_mode<synchronous>, transform_indices = @transform_7, window_bounds = array<i64: 96, 128>}, {pipeline_mode = #tpu.pipeline_mode<synchronous>, transform_indices = @transform_8, window_bounds = array<i64: 1, 128>}, {transform_indices = @transform_9, window_bounds = array<i64: 1, 16, 128>}]} {
    %c16_i32 = arith.constant 16 : i32
    %0 = arith.muli %arg1, %c16_i32 : i32
    %c0 = arith.constant 0 : index
    %c0_0 = arith.constant 0 : index
    %c0_1 = arith.constant 0 : index
    %1 = vector.load %arg3[%c0, %c0_0, %c0_1] : memref<1x8x8xf32, #tpu.memory_space<vmem>>, vector<1x8x8xf32>
    %2 = vector.shape_cast %1 : vector<1x8x8xf32> to vector<8x8xf32>
    %c0_2 = arith.constant 0 : index
    %c0_3 = arith.constant 0 : index
    %c0_4 = arith.constant 0 : index
    %3 = vector.load %arg2[%c0_2, %c0_3, %c0_4] : memref<1x16x8xf32, #tpu.memory_space<vmem>>, vector<1x16x8xf32>
    %4 = vector.shape_cast %3 : vector<1x16x8xf32> to vector<16x8xf32>
    %c0_5 = arith.constant 0 : index
    %c0_6 = arith.constant 0 : index
    %c0_7 = arith.constant 0 : index
    %5 = vector.load %arg4[%c0_5, %c0_6, %c0_7] : memref<1x8x8xf32, #tpu.memory_space<vmem>>, vector<1x8x8xf32>
    %6 = vector.shape_cast %5 : vector<1x8x8xf32> to vector<8x8xf32>
    %7 = tpu.concatenate %2, %4, %6 in 0 : vector<8x8xf32>, vector<16x8xf32>, vector<8x8xf32> -> vector<32x8xf32>
    %8 = arith.truncf %7 : vector<32x8xf32> to vector<32x8xbf16>
    %c0_8 = arith.constant 0 : index
    %c0_9 = arith.constant 0 : index
    %9 = vector.load %arg5[%c0_8, %c0_9] : memref<8x32xbf16, #tpu.memory_space<vmem>>, vector<8x32xbf16>
    %cst = arith.constant dense<0.000000e+00> : vector<32x32xf32>
    %10 = tpu.matmul %8, %9, %cst {dimension_numbers = #tpu.dot_dimension_numbers<[1], [0], [0], [1], [0, 0, 1, 1], [], []>} : vector<32x8xbf16>, vector<8x32xbf16>, vector<32x32xf32> -> vector<32x32xf32>
    %c0_10 = arith.constant 0 : index
    %c0_11 = arith.constant 0 : index
    %11 = vector.load %arg6[%c0_10, %c0_11] : memref<1x32xf32, #tpu.memory_space<vmem>>, vector<1x32xf32>
    %12 = vector.broadcast %11 : vector<1x32xf32> to vector<32x32xf32>
    %13 = arith.addf %10, %12 : vector<32x32xf32>
    %cst_12 = arith.constant 0.000000e+00 : f32
    %14 = vector.broadcast %cst_12 : f32 to vector<32x32xf32>
    %15 = arith.maximumf %13, %14 : vector<32x32xf32>
    %c8_i32 = arith.constant 8 : i32
    %16 = arith.subi %0, %c8_i32 : i32
    %17 = tpu.iota {dimensions = array<i32: 0>} : vector<32x32xi32>
    %18 = vector.broadcast %16 : i32 to vector<32x32xi32>
    %19 = arith.addi %18, %17 : vector<32x32xi32>
    %c0_i32 = arith.constant 0 : i32
    %20 = vector.broadcast %c0_i32 : i32 to vector<32x32xi32>
    %21 = arith.cmpi sge, %19, %20 : vector<32x32xi32>
    %c16_i32_13 = arith.constant 16 : i32
    %22 = vector.broadcast %c16_i32_13 : i32 to vector<32x32xi32>
    %23 = arith.cmpi slt, %19, %22 : vector<32x32xi32>
    %24 = arith.andi %21, %23 : vector<32x32xi1>
    %cst_14 = arith.constant 0.000000e+00 : f32
    %25 = vector.broadcast %cst_14 : f32 to vector<32x32xf32>
    %26 = arith.select %24, %15, %25 : vector<32x32xi1>, vector<32x32xf32>
    %c0_15 = arith.constant 0 : index
    %c0_16 = arith.constant 0 : index
    %27 = vector.load %arg12[%c0_15, %c0_16] : memref<32x32xf32, #tpu.memory_space<vmem>>, vector<32x32xf32>
    tpu.vector_store %arg12[%c0_15, %c0_16], %26 {strides = array<i32>} : memref<32x32xf32, #tpu.memory_space<vmem>>, vector<32x32xf32>,
    %c5 = arith.constant 5 : index
    %c0_17 = arith.constant 0 : index
    %28 = vector.load %arg12[%c5, %c0_17] : memref<32x32xf32, #tpu.memory_space<vmem>>, vector<16x32xf32>
    %29 = arith.truncf %28 : vector<16x32xf32> to vector<16x32xbf16>
    %c0_18 = arith.constant 0 : index
    %c0_19 = arith.constant 0 : index
    %c0_20 = arith.constant 0 : index
    %30 = vector.load %arg7[%c0_18, %c0_19, %c0_20] : memref<7x32x96xbf16, #tpu.memory_space<vmem>>, vector<1x32x96xbf16>
    %31 = vector.shape_cast %30 : vector<1x32x96xbf16> to vector<32x96xbf16>
    %cst_21 = arith.constant dense<0.000000e+00> : vector<16x96xf32>
    %32 = tpu.matmul %29, %31, %cst_21 {dimension_numbers = #tpu.dot_dimension_numbers<[1], [0], [0], [1], [0, 0, 1, 1], [], []>} : vector<16x32xbf16>, vector<32x96xbf16>, vector<16x96xf32> -> vector<16x96xf32>
    %c0_22 = arith.constant 0 : index
    %c0_23 = arith.constant 0 : index
    %33 = vector.load %arg13[%c0_22, %c0_23] : memref<16x96xf32, #tpu.memory_space<vmem>>, vector<16x96xf32>
    tpu.vector_store %arg13[%c0_22, %c0_23], %32 {strides = array<i32>} : memref<16x96xf32, #tpu.memory_space<vmem>>, vector<16x96xf32>,
    %c0_24 = arith.constant 0 : index
    %c0_25 = arith.constant 0 : index
    %34 = vector.load %arg13[%c0_24, %c0_25] : memref<16x96xf32, #tpu.memory_space<vmem>>, vector<16x96xf32>
    %c6 = arith.constant 6 : index
    %c0_26 = arith.constant 0 : index
    %35 = vector.load %arg12[%c6, %c0_26] : memref<32x32xf32, #tpu.memory_space<vmem>>, vector<16x32xf32>
    %36 = arith.truncf %35 : vector<16x32xf32> to vector<16x32xbf16>
    %c1 = arith.constant 1 : index
    %c0_27 = arith.constant 0 : index
    %c0_28 = arith.constant 0 : index
    %37 = vector.load %arg7[%c1, %c0_27, %c0_28] : memref<7x32x96xbf16, #tpu.memory_space<vmem>>, vector<1x32x96xbf16>
    %38 = vector.shape_cast %37 : vector<1x32x96xbf16> to vector<32x96xbf16>
    %cst_29 = arith.constant dense<0.000000e+00> : vector<16x96xf32>
    %39 = tpu.matmul %36, %38, %cst_29 {dimension_numbers = #tpu.dot_dimension_numbers<[1], [0], [0], [1], [0, 0, 1, 1], [], []>} : vector<16x32xbf16>, vector<32x96xbf16>, vector<16x96xf32> -> vector<16x96xf32>
    %40 = arith.addf %34, %39 : vector<16x96xf32>
    %c0_30 = arith.constant 0 : index
    %c0_31 = arith.constant 0 : index
    %41 = vector.load %arg13[%c0_30, %c0_31] : memref<16x96xf32, #tpu.memory_space<vmem>>, vector<16x96xf32>
    tpu.vector_store %arg13[%c0_30, %c0_31], %40 {strides = array<i32>} : memref<16x96xf32, #tpu.memory_space<vmem>>, vector<16x96xf32>,
    %c0_32 = arith.constant 0 : index
    %c0_33 = arith.constant 0 : index
    %42 = vector.load %arg13[%c0_32, %c0_33] : memref<16x96xf32, #tpu.memory_space<vmem>>, vector<16x96xf32>
    %c7 = arith.constant 7 : index
    %c0_34 = arith.constant 0 : index
    %43 = vector.load %arg12[%c7, %c0_34] : memref<32x32xf32, #tpu.memory_space<vmem>>, vector<16x32xf32>
    %44 = arith.truncf %43 : vector<16x32xf32> to vector<16x32xbf16>
    %c2 = arith.constant 2 : index
    %c0_35 = arith.constant 0 : index
    %c0_36 = arith.constant 0 : index
    %45 = vector.load %arg7[%c2, %c0_35, %c0_36] : memref<7x32x96xbf16, #tpu.memory_space<vmem>>, vector<1x32x96xbf16>
    %46 = vector.shape_cast %45 : vector<1x32x96xbf16> to vector<32x96xbf16>
    %cst_37 = arith.constant dense<0.000000e+00> : vector<16x96xf32>
    %47 = tpu.matmul %44, %46, %cst_37 {dimension_numbers = #tpu.dot_dimension_numbers<[1], [0], [0], [1], [0, 0, 1, 1], [], []>} : vector<16x32xbf16>, vector<32x96xbf16>, vector<16x96xf32> -> vector<16x96xf32>
    %48 = arith.addf %42, %47 : vector<16x96xf32>
    %c0_38 = arith.constant 0 : index
    %c0_39 = arith.constant 0 : index
    %49 = vector.load %arg13[%c0_38, %c0_39] : memref<16x96xf32, #tpu.memory_space<vmem>>, vector<16x96xf32>
    tpu.vector_store %arg13[%c0_38, %c0_39], %48 {strides = array<i32>} : memref<16x96xf32, #tpu.memory_space<vmem>>, vector<16x96xf32>,
    %c0_40 = arith.constant 0 : index
    %c0_41 = arith.constant 0 : index
    %50 = vector.load %arg13[%c0_40, %c0_41] : memref<16x96xf32, #tpu.memory_space<vmem>>, vector<16x96xf32>
    %c8 = arith.constant 8 : index
    %c0_42 = arith.constant 0 : index
    %51 = vector.load %arg12[%c8, %c0_42] : memref<32x32xf32, #tpu.memory_space<vmem>>, vector<16x32xf32>
    %52 = arith.truncf %51 : vector<16x32xf32> to vector<16x32xbf16>
    %c3 = arith.constant 3 : index
    %c0_43 = arith.constant 0 : index
    %c0_44 = arith.constant 0 : index
    %53 = vector.load %arg7[%c3, %c0_43, %c0_44] : memref<7x32x96xbf16, #tpu.memory_space<vmem>>, vector<1x32x96xbf16>
    %54 = vector.shape_cast %53 : vector<1x32x96xbf16> to vector<32x96xbf16>
    %cst_45 = arith.constant dense<0.000000e+00> : vector<16x96xf32>
    %55 = tpu.matmul %52, %54, %cst_45 {dimension_numbers = #tpu.dot_dimension_numbers<[1], [0], [0], [1], [0, 0, 1, 1], [], []>} : vector<16x32xbf16>, vector<32x96xbf16>, vector<16x96xf32> -> vector<16x96xf32>
    %56 = arith.addf %50, %55 : vector<16x96xf32>
    %c0_46 = arith.constant 0 : index
    %c0_47 = arith.constant 0 : index
    %57 = vector.load %arg13[%c0_46, %c0_47] : memref<16x96xf32, #tpu.memory_space<vmem>>, vector<16x96xf32>
    tpu.vector_store %arg13[%c0_46, %c0_47], %56 {strides = array<i32>} : memref<16x96xf32, #tpu.memory_space<vmem>>, vector<16x96xf32>,
    %c0_48 = arith.constant 0 : index
    %c0_49 = arith.constant 0 : index
    %58 = vector.load %arg13[%c0_48, %c0_49] : memref<16x96xf32, #tpu.memory_space<vmem>>, vector<16x96xf32>
    %c9 = arith.constant 9 : index
    %c0_50 = arith.constant 0 : index
    %59 = vector.load %arg12[%c9, %c0_50] : memref<32x32xf32, #tpu.memory_space<vmem>>, vector<16x32xf32>
    %60 = arith.truncf %59 : vector<16x32xf32> to vector<16x32xbf16>
    %c4 = arith.constant 4 : index
    %c0_51 = arith.constant 0 : index
    %c0_52 = arith.constant 0 : index
    %61 = vector.load %arg7[%c4, %c0_51, %c0_52] : memref<7x32x96xbf16, #tpu.memory_space<vmem>>, vector<1x32x96xbf16>
    %62 = vector.shape_cast %61 : vector<1x32x96xbf16> to vector<32x96xbf16>
    %cst_53 = arith.constant dense<0.000000e+00> : vector<16x96xf32>
    %63 = tpu.matmul %60, %62, %cst_53 {dimension_numbers = #tpu.dot_dimension_numbers<[1], [0], [0], [1], [0, 0, 1, 1], [], []>} : vector<16x32xbf16>, vector<32x96xbf16>, vector<16x96xf32> -> vector<16x96xf32>
    %64 = arith.addf %58, %63 : vector<16x96xf32>
    %c0_54 = arith.constant 0 : index
    %c0_55 = arith.constant 0 : index
    %65 = vector.load %arg13[%c0_54, %c0_55] : memref<16x96xf32, #tpu.memory_space<vmem>>, vector<16x96xf32>
    tpu.vector_store %arg13[%c0_54, %c0_55], %64 {strides = array<i32>} : memref<16x96xf32, #tpu.memory_space<vmem>>, vector<16x96xf32>,
    %c0_56 = arith.constant 0 : index
    %c0_57 = arith.constant 0 : index
    %66 = vector.load %arg13[%c0_56, %c0_57] : memref<16x96xf32, #tpu.memory_space<vmem>>, vector<16x96xf32>
    %c10 = arith.constant 10 : index
    %c0_58 = arith.constant 0 : index
    %67 = vector.load %arg12[%c10, %c0_58] : memref<32x32xf32, #tpu.memory_space<vmem>>, vector<16x32xf32>
    %68 = arith.truncf %67 : vector<16x32xf32> to vector<16x32xbf16>
    %c5_59 = arith.constant 5 : index
    %c0_60 = arith.constant 0 : index
    %c0_61 = arith.constant 0 : index
    %69 = vector.load %arg7[%c5_59, %c0_60, %c0_61] : memref<7x32x96xbf16, #tpu.memory_space<vmem>>, vector<1x32x96xbf16>
    %70 = vector.shape_cast %69 : vector<1x32x96xbf16> to vector<32x96xbf16>
    %cst_62 = arith.constant dense<0.000000e+00> : vector<16x96xf32>
    %71 = tpu.matmul %68, %70, %cst_62 {dimension_numbers = #tpu.dot_dimension_numbers<[1], [0], [0], [1], [0, 0, 1, 1], [], []>} : vector<16x32xbf16>, vector<32x96xbf16>, vector<16x96xf32> -> vector<16x96xf32>
    %72 = arith.addf %66, %71 : vector<16x96xf32>
    %c0_63 = arith.constant 0 : index
    %c0_64 = arith.constant 0 : index
    %73 = vector.load %arg13[%c0_63, %c0_64] : memref<16x96xf32, #tpu.memory_space<vmem>>, vector<16x96xf32>
    tpu.vector_store %arg13[%c0_63, %c0_64], %72 {strides = array<i32>} : memref<16x96xf32, #tpu.memory_space<vmem>>, vector<16x96xf32>,
    %c0_65 = arith.constant 0 : index
    %c0_66 = arith.constant 0 : index
    %74 = vector.load %arg13[%c0_65, %c0_66] : memref<16x96xf32, #tpu.memory_space<vmem>>, vector<16x96xf32>
    %c11 = arith.constant 11 : index
    %c0_67 = arith.constant 0 : index
    %75 = vector.load %arg12[%c11, %c0_67] : memref<32x32xf32, #tpu.memory_space<vmem>>, vector<16x32xf32>
    %76 = arith.truncf %75 : vector<16x32xf32> to vector<16x32xbf16>
    %c6_68 = arith.constant 6 : index
    %c0_69 = arith.constant 0 : index
    %c0_70 = arith.constant 0 : index
    %77 = vector.load %arg7[%c6_68, %c0_69, %c0_70] : memref<7x32x96xbf16, #tpu.memory_space<vmem>>, vector<1x32x96xbf16>
    %78 = vector.shape_cast %77 : vector<1x32x96xbf16> to vector<32x96xbf16>
    %cst_71 = arith.constant dense<0.000000e+00> : vector<16x96xf32>
    %79 = tpu.matmul %76, %78, %cst_71 {dimension_numbers = #tpu.dot_dimension_numbers<[1], [0], [0], [1], [0, 0, 1, 1], [], []>} : vector<16x32xbf16>, vector<32x96xbf16>, vector<16x96xf32> -> vector<16x96xf32>
    %80 = arith.addf %74, %79 : vector<16x96xf32>
    %c0_72 = arith.constant 0 : index
    %c0_73 = arith.constant 0 : index
    %81 = vector.load %arg13[%c0_72, %c0_73] : memref<16x96xf32, #tpu.memory_space<vmem>>, vector<16x96xf32>
    tpu.vector_store %arg13[%c0_72, %c0_73], %80 {strides = array<i32>} : memref<16x96xf32, #tpu.memory_space<vmem>>, vector<16x96xf32>,
    %c0_74 = arith.constant 0 : index
    %c0_75 = arith.constant 0 : index
    %82 = vector.load %arg13[%c0_74, %c0_75] : memref<16x96xf32, #tpu.memory_space<vmem>>, vector<16x96xf32>
    %c0_76 = arith.constant 0 : index
    %c0_77 = arith.constant 0 : index
    %83 = vector.load %arg8[%c0_76, %c0_77] : memref<1x96xf32, #tpu.memory_space<vmem>>, vector<1x96xf32>
    %84 = vector.broadcast %83 : vector<1x96xf32> to vector<16x96xf32>
    %85 = arith.addf %82, %84 : vector<16x96xf32>
    %cst_78 = arith.constant 0.000000e+00 : f32
    %86 = vector.broadcast %cst_78 : f32 to vector<16x96xf32>
    %87 = arith.maximumf %85, %86 : vector<16x96xf32>
    %88 = arith.truncf %87 : vector<16x96xf32> to vector<16x96xbf16>
    %c0_79 = arith.constant 0 : index
    %c0_80 = arith.constant 0 : index
    %89 = vector.load %arg9[%c0_79, %c0_80] : memref<96x128xbf16, #tpu.memory_space<vmem>>, vector<96x128xbf16>
    %cst_81 = arith.constant dense<0.000000e+00> : vector<16x128xf32>
    %90 = tpu.matmul %88, %89, %cst_81 {dimension_numbers = #tpu.dot_dimension_numbers<[1], [0], [0], [1], [0, 0, 1, 1], [], []>} : vector<16x96xbf16>, vector<96x128xbf16>, vector<16x128xf32> -> vector<16x128xf32>
    %c0_82 = arith.constant 0 : index
    %c0_83 = arith.constant 0 : index
    %91 = vector.load %arg10[%c0_82, %c0_83] : memref<1x128xf32, #tpu.memory_space<vmem>>, vector<1x128xf32>
    %92 = vector.broadcast %91 : vector<1x128xf32> to vector<16x128xf32>
    %93 = arith.addf %90, %92 : vector<16x128xf32>
    %c0_84 = arith.constant 0 : index
    %c0_85 = arith.constant 0 : index
    %c0_86 = arith.constant 0 : index
    %94 = vector.load %arg11[%c0_84, %c0_85, %c0_86] : memref<1x16x128xf32, #tpu.memory_space<vmem>>, vector<1x16x128xf32>
    %95 = vector.shape_cast %94 : vector<1x16x128xf32> to vector<16x128xf32>
    %96 = vector.shape_cast %93 : vector<16x128xf32> to vector<1x16x128xf32>
    tpu.vector_store %arg11[%c0_84, %c0_85, %c0_86], %96 {strides = array<i32>} : memref<1x16x128xf32, #tpu.memory_space<vmem>>, vector<1x16x128xf32>,
    return
  }
  func.func @transform_0(%arg0: i32, %arg1: i32) -> (i32, i32, i32) {
    %c0_i32 = arith.constant 0 : i32
    %c0_i32_0 = arith.constant 0 : i32
    return %arg0, %arg1, %c0_i32 : i32, i32, i32
  }
  func.func @transform_1(%arg0: i32, %arg1: i32) -> (i32, i32, i32) {
    %c2_i32 = arith.constant 2 : i32
    %0 = arith.muli %arg1, %c2_i32 : i32
    %c1_i32 = arith.constant 1 : i32
    %1 = arith.subi %0, %c1_i32 : i32
    %c0_i32 = arith.constant 0 : i32
    %2 = arith.maxsi %1, %c0_i32 : i32
    %c0_i32_0 = arith.constant 0 : i32
    %c0_i32_1 = arith.constant 0 : i32
    return %arg0, %2, %c0_i32_0 : i32, i32, i32
  }
  func.func @transform_2(%arg0: i32, %arg1: i32) -> (i32, i32, i32) {
    %c1_i32 = arith.constant 1 : i32
    %0 = arith.addi %arg1, %c1_i32 : i32
    %c2_i32 = arith.constant 2 : i32
    %1 = arith.muli %0, %c2_i32 : i32
    %c1_i32_0 = arith.constant 1 : i32
    %2 = arith.minsi %1, %c1_i32_0 : i32
    %c0_i32 = arith.constant 0 : i32
    %c0_i32_1 = arith.constant 0 : i32
    return %arg0, %2, %c0_i32 : i32, i32, i32
  }
  func.func @transform_3(%arg0: i32, %arg1: i32) -> (i32, i32) {
    %c0_i32 = arith.constant 0 : i32
    %c0_i32_0 = arith.constant 0 : i32
    %c0_i32_1 = arith.constant 0 : i32
    return %c0_i32, %c0_i32_0 : i32, i32
  }
  func.func @transform_4(%arg0: i32, %arg1: i32) -> (i32, i32) {
    %c0_i32 = arith.constant 0 : i32
    %c0_i32_0 = arith.constant 0 : i32
    %c0_i32_1 = arith.constant 0 : i32
    return %c0_i32, %c0_i32_0 : i32, i32
  }
  func.func @transform_5(%arg0: i32, %arg1: i32) -> (i32, i32, i32) {
    %c0_i32 = arith.constant 0 : i32
    %c0_i32_0 = arith.constant 0 : i32
    %c0_i32_1 = arith.constant 0 : i32
    %c0_i32_2 = arith.constant 0 : i32
    return %c0_i32, %c0_i32_0, %c0_i32_1 : i32, i32, i32
  }
  func.func @transform_6(%arg0: i32, %arg1: i32) -> (i32, i32) {
    %c0_i32 = arith.constant 0 : i32
    %c0_i32_0 = arith.constant 0 : i32
    %c0_i32_1 = arith.constant 0 : i32
    return %c0_i32, %c0_i32_0 : i32, i32
  }
  func.func @transform_7(%arg0: i32, %arg1: i32) -> (i32, i32) {
    %c0_i32 = arith.constant 0 : i32
    %c0_i32_0 = arith.constant 0 : i32
    %c0_i32_1 = arith.constant 0 : i32
    return %c0_i32, %c0_i32_0 : i32, i32
  }
  func.func @transform_8(%arg0: i32, %arg1: i32) -> (i32, i32) {
    %c0_i32 = arith.constant 0 : i32
    %c0_i32_0 = arith.constant 0 : i32
    %c0_i32_1 = arith.constant 0 : i32
    return %c0_i32, %c0_i32_0 : i32, i32
  }
  func.func @transform_9(%arg0: i32, %arg1: i32) -> (i32, i32, i32) {
    %c0_i32 = arith.constant 0 : i32
    %c0_i32_0 = arith.constant 0 : i32
    return %arg0, %arg1, %c0_i32 : i32, i32, i32
  }
}

</mosaic_0001>

<bundles_post_ra>
// kernel: tpu_custom_call.1
= control target key start
LH: loop header
LB: loop body
LE: loop exit
PB: predicated region body
PF: predicated region fallthrough
CT: control target
= control target key end

     0   :  { %14 = vsyncpa [#allocation5], 0  ;;  %s2091_s0 = inlined_call_operand.vmem [shape: f32[2,16,8], index: 0, kind: input, shape index: {}]   ;;  %s2092_s1 = inlined_call_operand.vmem [shape: f32[2,16,8], index: 1, kind: input, shape index: {}]   ;;  %s2093_s2 = inlined_call_operand.vmem [shape: f32[2,16,8], index: 2, kind: input, shape index: {}]   ;;  %s2094_s3 = inlined_call_operand.hbm [shape: bf16[8,32], index: 3, kind: input, shape index: {}]   ;;  %s2095_s4 = inlined_call_operand.vmem [shape: f32[1,32], index: 4, kind: input, shape index: {}]   ;;  %s2096_s5 = inlined_call_operand.vmem [shape: bf16[7,32,96], index: 5, kind: input, shape index: {}]   ;;  %s2097_s6 = inlined_call_operand.vmem [shape: f32[1,96], index: 6, kind: input, shape index: {}]   ;;  %s2098_s7 = inlined_call_operand.vmem [shape: bf16[96,128], index: 7, kind: input, shape index: {}]   ;;  %s2099_s8 = inlined_call_operand.vmem [shape: f32[1,128], index: 8, kind: input, shape index: {}]   ;;  %s2100_s9 = inlined_call_operand.hbm [shape: f32[2,16,128], index: 9, kind: output, shape index: {}]  }
   0x1   :  { %15 = vsyncpa [#allocation6], 0 }
   0x2   :  { %17 = vsyncpa [#allocation6 + $0x1], 0  ;;  %s1799_s30 = smov 0   ;;  %s1801_s10 = smov 0  }
   0x3   :  { %s1803_s11 = smov 0   ;;  %s1805_s12 = smov 0  }
   0x4   :  { %s1807_s13 = smov 0   ;;  %s1809_s14 = smov 0  }
   0x5 LB: > { %s1349_s15 = sadd.s32 4294967295, %s1741_s14   ;;  %s1350_s16 = sadd.s32 4294967294, %s1741_s14   ;;  %s1741_s14 = sphi %s1809_s14, %s23_s14   ;;  %s1737_s13 = sphi %s1807_s13, %s2121_s13   ;;  %s1733_s12 = sphi %s1805_s12, %s2120_s12   ;;  %s1729_s11 = sphi %s1803_s11, %s2119_s11   ;;  %s1725_s10 = sphi %s1801_s10, %s2118_s10   ;;  %s1721_s30 = sphi %s1799_s30, %s2117_s30  }
   0x6   : > { %s35_s17 = sadd.s32 1, %s1737_s13  ;;  %s270_s18 = sadd.s32 1, %s1729_s11 }
   0x7   : > { %p37_p0 = scmp.ge.s32.totalorder %s35_s17, 2  ;;  %p280_p1 = scmp.ne.s32.totalorder %s1729_s11, %s1725_s10 }
   0x8   : > { %p281_p2 = scmp.eq.s32.totalorder %s1349_s15, 1  ;;  %p286_p3 = scmp.ne.s32.totalorder %s1725_s10, %s1721_s30 }
   0x9   : > { %s2123_s17 = smov (%p37_p0, %s35_s17), 0  ;;  %p287_p5 = scmp.eq.s32.totalorder %s1350_s16, 1 }
   0xa   : > { %2106 = sst [smem:[#allocation10_spill]] %s2123_s17  ;;  %p1839_p4 = por %p281_p2, %p280_p1 }
   0xb   : > { %s265_s20 = ssub.s32 %s1737_s13, %s2123_s17  ;;  %p1351_p6 = scmp.ge.s32.totalorder %s1741_s14, 1 }
   0xc   : > { %s2107_s19 = scalar_select %p1839_p4, 1, 0 }
   0xd   : > { %p268_p7 = scmp.eq.s32.totalorder %s265_s20, 0  ;;  %p1846_p8 = por %p287_p5, %p286_p3 }
   0xe   : > { %p294_p9 = scmp.lt.s32.totalorder %s1741_s14, 3  ;;  %p1858_p11 = scmp.eq.s32.totalorder %s1349_s15, 0 }
   0xf   : > { %s2108_s21 = scalar_select %p1846_p8, 1, 0 }
  0x10   : > { %s1852_s22 = scalar_select %p268_p7, %s1729_s11, %s270_s18  }
  0x11   : > { %p1854_p10 = pnand %p1351_p6, %p294_p9  ;;  %s1743_s25 = smov [#allocation4]  }
  0x12   : > { %s2110_s24 = scalar_select %p1858_p11, 1, 0 }
  0x13   : > { %s2109_s23 = scalar_select %p1854_p10, 1, 0 }
  0x14   : > { %p1547_p12 = pneg %p1854_p10  ;;  %s307_s26 = sshll.u32 %s1743_s25, 4  ;;  %s308_s26 = int_to_ptr.vmem [resolvable:$true] %s307_s26 }
  0x15   : > { %s1631_s16 = scalar_lea.hbm %s2094_s3, 64 }
  0x16   : > { %p1866_p13 = pnand %p1858_p11, %p1547_p12  ;;  %p1632_p0 = scmp.ne.s32.totalorder %s2094_s3, %s1631_s16 }
  0x17   : > { %p1638_p5 = scmp.lt.u32.totalorder %s1631_s16, %s2094_s3 }
  0x18   : > { %p1633_p1 = pneg %p1866_p13 }
  0x1a   : > { %p1634_p2 = pnand %p1633_p1, %p1632_p0 }
  0x1c   : > { %p1635_p3 = pneg %p1634_p2 }
  0x1e   : > { %p1640_p6 = pnand %p1638_p5, %p1635_p3 }
  0x20   : > { %1643 = shalt.err (!%p1640_p6)
}
  0x21   : > { %s1644_s17 = scalar_lea.vmem %s308_s26, 64  ;;  %p1652_p8 = scmp.lt.s32.totalorder %s308_s26, %s308_s26 }
  0x22   : > { %p1645_p7 = scmp.ne.s32.totalorder %s308_s26, %s1644_s17  ;;  %p1653_p4 = scmp.lt.s32.totalorder %s1644_s17, %s1644_s17 }
  0x24   : > { %p1647_p9 = pnand %p1645_p7, %p1633_p1  ;;  %p1654_p11 = por %p1653_p4, %p1652_p8 }
  0x26   : > { %p1648_p12 = pneg %p1647_p9 }
  0x28   : > { %p1655_p10 = pnand %p1654_p11, %p1648_p12 }
  0x2a   : > { %1658 = shalt.err (!%p1655_p10)
}
  0x2b   : > { %1550 = dma.hbm_to_vmem [thread:$0]  (!%p1866_p13), %s2094_s3, 64, %s308_s26, [#allocation5]  }
  0x2c   : > { %p2112_p0 = scmp.ne.s32.totalorder %s2109_s23, 0 }
  0x2d   : > { %p2113_p2 = scmp.ne.s32.totalorder (!%p2112_p0), %s2110_s24, 0 }
  0x2e   : > { %386 = sbr.rel (%p2112_p0) target bundleno = 813 (0x32d), region = 56 }
  0x35   : > { %1712 = dma.done.wait (%p2113_p2), [#allocation5], 64  }
  0x36   : > { %1714 = vsyncadd (%p2113_p2), [#allocation5], 4294967232  ;;  %p451_p4 = scmp.lt.s32.totalorder %s1733_s12, 1  ;;  %vm516_vm0 = vcmask 1043456   ;;  %v501_v0 = vld [vmem:[#allocation4] sm:$0xf] }
  0x37   : > { %vm509_vm1 = vcmask 64512   ;;  %1540 = vmatprep.subr.msk.bf16.mxu0 %vm516_vm0, %v501_v0  ;;  %v518_v3 = vsel %vm516_vm0, %v501_v0, 0  ;;  %vm600_vm2 = vcmask 261120   ;;  %v1744_v8 = vmov 0.0   ;;  %v1611_v9 = vld [vmem:[%s2096_s5] sm:$0xff]   ;;  %v1612_v10 = vld [vmem:[%s2096_s5 + $0x30] sm:$0xff]  }
  0x38   : > { %s452_s17 = scalar_select %p451_p4, %s1733_s12, 1  ;;  %1463 = vmatpush3.bf16.msra.mxu0 %v518_v3  ;;  %1468 = vmatprep.subr.bf16.mxu1 %v1744_v8  ;;  %601 = vst.msk [vmem:[#allocation2] sm:$0xff] %vm600_vm2, %v1744_v8  ;;  %604 = vst.msk [vmem:[#allocation2 + $0x18] sm:$0xff] %vm600_vm2, %v1744_v8  ;;  %vm1745_vm3 = vmmov 0   ;;  %v1613_v11 = vld [vmem:[%s2096_s5 + $0x8] sm:$0xff]   ;;  %v1614_v12 = vld [vmem:[%s2096_s5 + $0x38] sm:$0xff]  }
  0x39   : > { %1492 = vmatprep.subr.bf16.mxu0 %v1744_v8  ;;  %1472 = vmatprep.mubr.msk.bf16.mxu1 %vm1745_vm3, %v1744_v8  ;;  %v1363_v13 = vld [vmem:[%s2095_s4] ss:$0 sm:$0xff]  ;;  %v1615_v22 = vld [vmem:[%s2096_s5 + $0x10] sm:$0xff]   ;;  %v1617_v30 = vld [vmem:[%s2096_s5 + $0x18] sm:$0xff]   ;;  %vm668_vm4 = vcmask 785408   ;;  %s1429_s27 = sshll.u32 %s1733_s12, 8 }
  0x3a   : > { %s1425_s16 = sshll.u32 %s452_s17, 4  ;;  %1469 = vmatpush3.bf16.msra.mxu1 %v1611_v9  ;;  %v1616_v24 = vld [vmem:[%s2096_s5 + $0x50] sm:$0xff]   ;;  %v1618_v31 = vld [vmem:[%s2096_s5 + $0x58] sm:$0xff]   ;;  %v1619_v36 = vld [vmem:[%s2096_s5 + $0x20] sm:$0xff]   ;;  %s2043_s26 = scalar_lea.hbm %s2100_s9, %s1429_s27 }
  0x3b   : > { %s458_s18 = scalar_lea.vmem %s2091_s0, %s1425_s16  ;;  %s471_s23 = scalar_lea.vmem %s2092_s1, %s1425_s16  ;;  %1470 = vmatprep.subr.bf16.mxu1 %v1744_v8  ;;  %v1620_v39 = vld [vmem:[%s2096_s5 + $0x28] sm:$0xff]   ;;  %v1621_v42 = vld [vmem:[%s2096_s5 + $0x40] sm:$0xff]   ;;  %v1627_v55 = vld [vmem:[%s2098_s7 + $0x10] sm:$0xff]  }
  0x3c   : > { %s1428_s25 = sadd.s32 8, %s1425_s16  ;;  %v495_v1 = vld [vmem:[%s471_s23] sm:$0xff]  ;;  %v497_v4 = vld [vmem:[%s458_s18 + $0x8] sm:$0xff]  ;;  %v1628_v56 = vld [vmem:[%s2098_s7 + $0x18] sm:$0xff]   ;;  %p2114_p10 = scmp.ne.s32.totalorder %s2107_s19, 0 }
  0x3d   : > { %s487_s24 = scalar_lea.vmem %s2093_s2, %s1428_s25  ;;  %v496_v2 = vld [vmem:[%s458_s18] sm:$0xff]  ;;  %v1622_v44 = vld [vmem:[%s2096_s5 + $0x48] sm:$0xff]   ;;  %s447_s25 = sand.u32 1, %s1725_s10  }
  0x3e   : > { %v498_v5 = vld [vmem:[%s487_s24] sm:$0xff]  ;;  %v499_v6 = vpack.c.bf16 %v496_v2, %v495_v1  ;;  %1471 = vmatpush3.bf16.msra.mxu1 %v1613_v11  ;;  %v1624_v49 = vld [vmem:[%s2096_s5 + $0x68] sm:$0xff]   ;;  %s1356_s28 = sshll.u32 %s447_s25, 4  ;;  %s2045_s20 = scalar_lea.sflag [#allocation6], %s447_s25 }
  0x3f   : > { %v500_v7 = vpack.c.bf16 %v498_v5, %v497_v4  ;;  %1476 = vmatprep.subr.bf16.mxu1 %v1744_v8  ;;  %v1623_v47 = vld [vmem:[%s2096_s5 + $0x60] sm:$0xff]   ;;  %v1626_v54 = vld [vmem:[%s2098_s7 + $0x8] sm:$0xff]   ;;  %s449_s17 = scalar_lea.vmem [#allocation7], %s1356_s28  ;;  %s1746_s23 = smov [#allocation7]  }
  0x40   : > { %1464 = vmatprep.mubr.msk.bf16.mxu0 %vm509_vm1, %v499_v6  ;;  %v1625_v53 = vld [vmem:[%s2098_s7] sm:$0xff]   ;;  %v1630_v58 = vld [vmem:[%s2098_s7 + $0x28] sm:$0xff]   ;;  %s1222_s16 = sshll.u32 %s449_s17, 4  ;;  %s1663_s28 = sshll.u32 %s1746_s23, 4  ;;  %s2038_s16 = int_to_ptr.vmem [resolvable:$true] %s1222_s16  ;;  %s1664_s28 = int_to_ptr.vmem [resolvable:$false] %s1663_s28 }
  0x41   : > { %1465 = vmatmul.mubr.msk.bf16.vlgmr.msra.gmra.mrb[0].mxu0 %vm509_vm1, %v500_v7  ;;  %v1629_v57 = vld [vmem:[%s2098_s7 + $0x20] sm:$0xff]   ;;  %s1659_s12 = scalar_lea.vmem %s2038_s16, 256  ;;  %s1665_s29 = scalar_lea.vmem %s1664_s28, 512 }
  0x42   : > { %1496 = vmatprep.mubr.msk.bf16.mxu0 %vm1745_vm3, %v1744_v8  ;;  %1493 = vmatpush3.bf16.msra.mxu0 %v1612_v10  ;;  %p1660_p8 = scmp.ne.s32.totalorder %s2038_s16, %s1659_s12  ;;  %p1666_p1 = scmp.lt.s32.totalorder %s2038_s16, %s1664_s28 }
  0x43   : > { %1494 = vmatprep.subr.bf16.mxu0 %v1744_v8  ;;  %p1667_p3 = scmp.lt.s32.totalorder %s1665_s29, %s1659_s12 }
  0x44   : > { %p1661_p11 = pnand %p1660_p8, %p2114_p10 }
  0x45   : > { %p1668_p5 = por %p1667_p3, %p1666_p1 }
  0x46   : > { %1495 = vmatpush3.bf16.msra.mxu0 %v1614_v12  ;;  %p1662_p13 = pneg %p1661_p11 }
  0x47   : > { %1508 = vmatprep.subr.bf16.mxu0 %v1744_v8 }
  0x48   : > { %p1669_p6 = pnand %p1668_p5, %p1662_p13 }
 0x114   : > { %v1466_v14 = vpop.f32.mrb[0].mxu0 }
 0x115   : > { %v563_v15 = vadd.f32 %v1466_v14, %v1363_v13  ;;  %v554_v16 = vpop.f32.mrb[1].mxu0 }
 0x116   : > { %v1467_v17 = vpop.f32.mrb[2].mxu0 }
 0x117   : > { %v571_v18 = vmax.f32 %v563_v15, 0.0  ;;  %v557_v19 = vpop.f32.mrb[3].mxu0 }
 0x118   : > { %v558_v20 = vadd.f32 %v1363_v13, %v557_v19 }
 0x119   : > { %603 = vst.msk [vmem:[#allocation2 + $0x10] sm:$0xff] %vm600_vm2, %v571_v18 }
 0x11a   : > { %v570_v21 = vmax.f32 %v558_v20, 0.0 }
 0x11c   : > { %602 = vst.msk [vmem:[#allocation2 + $0x8] sm:$0xff] %vm600_vm2, %v570_v21 }
 0x120   : > { %v814_v23 = vld [vmem:[#allocation2 + $0x10] sm:$0xff] }
 0x121   : > { %v954_v35 = vld [vmem:[#allocation2 + $0x12] sm:$0xff] }
 0x122   : > { %v884_v46 = vld [vmem:[#allocation2 + $0x11] sm:$0xff] }
 0x123   : > { %v605_v25 = vld [vmem:[#allocation2 + $0x5] sm:$0xff]  ;;  %v606_v26 = vld [vmem:[#allocation2 + $0xd] sm:$0xff] }
 0x124   : > { %v813_v27 = vld [vmem:[#allocation2 + $0x8] sm:$0xff]  ;;  %v607_v28 = vpack.c.bf16 %v606_v26, %v605_v25  ;;  %v1024_v51 = vld [vmem:[#allocation2 + $0x13] sm:$0xff] }
 0x125   : > { %v815_v29 = vpack.c.bf16 %v814_v23, %v813_v27  ;;  %v673_v32 = vld [vmem:[#allocation2 + $0x6] sm:$0xff]  ;;  %v674_v33 = vld [vmem:[#allocation2 + $0xe] sm:$0xff] }
 0x126   : > { %1473 = vmatmul.mubr.msk.bf16.vlgmr.msra.gmra.mrb[0].mxu1 %vm600_vm2, %v607_v28  ;;  %v953_v34 = vld [vmem:[#allocation2 + $0xa] sm:$0xff]  ;;  %v675_v37 = vpack.c.bf16 %v674_v33, %v673_v32 }
 0x127   : > { %1497 = vmatmul.mubr.msk.bf16.vlgmr.msra.gmra.mrb[4].mxu0 %vm600_vm2, %v815_v29  ;;  %1477 = vmatpush3.bf16.msra.mxu1 %v1615_v22  ;;  %v955_v38 = vpack.c.bf16 %v954_v35, %v953_v34  ;;  %v743_v40 = vld [vmem:[#allocation2 + $0x7] sm:$0xff]  ;;  %v744_v41 = vld [vmem:[#allocation2 + $0xf] sm:$0xff] }
 0x128   : > { %1509 = vmatpush3.bf16.msra.mxu0 %v1616_v24  ;;  %1478 = vmatprep.subr.bf16.mxu1 %v1744_v8  ;;  %v745_v43 = vpack.c.bf16 %v744_v41, %v743_v40  ;;  %v883_v45 = vld [vmem:[#allocation2 + $0x9] sm:$0xff] }
 0x129   : > { %1510 = vmatprep.subr.bf16.mxu0 %v1744_v8  ;;  %1480 = vmatprep.mubr.msk.bf16.mxu1 %vm1745_vm3, %v1744_v8  ;;  %v885_v48 = vpack.c.bf16 %v884_v46, %v883_v45  ;;  %v1023_v50 = vld [vmem:[#allocation2 + $0xb] sm:$0xff] }
 0x12a   : > { %1512 = vmatprep.mubr.msk.bf16.mxu0 %vm1745_vm3, %v1744_v8  ;;  %v1025_v52 = vpack.c.bf16 %v1024_v51, %v1023_v50 }
 0x12b   : > { %1479 = vmatpush3.bf16.msra.mxu1 %v1617_v30 }
 0x12c   : > { %1511 = vmatpush3.bf16.msra.mxu0 %v1618_v31  ;;  %1484 = vmatprep.subr.bf16.mxu1 %v1744_v8 }
 0x12d   : > { %1524 = vmatprep.subr.bf16.mxu0 %v1744_v8 }
 0x12e   : > { %1481 = vmatmul.mubr.msk.bf16.vlgmr.msra.gmra.mrb[4].mxu1 %vm600_vm2, %v675_v37 }
 0x12f   : > { %1513 = vmatmul.mubr.msk.bf16.vlgmr.msra.gmra.mrb[8].mxu0 %vm600_vm2, %v955_v38  ;;  %1485 = vmatpush3.bf16.msra.mxu1 %v1619_v36 }
 0x130   : > { %1488 = vmatprep.mubr.msk.bf16.mxu1 %vm1745_vm3, %v1744_v8  ;;  %1486 = vmatprep.subr.bf16.mxu1 %v1744_v8 }
 0x131   : > { %1536 = vmatprep.mubr.msk.bf16.mxu0 %vm1745_vm3, %v1744_v8  ;;  %1525 = vmatpush3.bf16.msra.mxu0 %v1625_v53 }
 0x132   : > { %1526 = vmatprep.subr.bf16.mxu0 %v1744_v8 }
 0x133   : > { %1487 = vmatpush3.bf16.msra.mxu1 %v1620_v39 }
 0x134   : > { %1500 = vmatprep.subr.bf16.mxu1 %v1744_v8 }
 0x135   : > { %1527 = vmatpush3.bf16.msra.mxu0 %v1626_v54 }
 0x136   : > { %1489 = vmatmul.mubr.msk.bf16.vlgmr.msra.gmra.mrb[8].mxu1 %vm600_vm2, %v745_v43  ;;  %1528 = vmatprep.subr.bf16.mxu0 %v1744_v8 }
 0x137   : > { %1501 = vmatpush3.bf16.msra.mxu1 %v1621_v42  ;;  %1504 = vmatprep.mubr.msk.bf16.mxu1 %vm1745_vm3, %v1744_v8 }
 0x138   : > { %1502 = vmatprep.subr.bf16.mxu1 %v1744_v8 }
 0x139   : > { %1529 = vmatpush3.bf16.msra.mxu0 %v1627_v55  ;;  %v1412_v55 = vld [vmem:[%s2099_s8] ss:$0 sm:$0xff] }
 0x13a   : > { %1530 = vmatprep.subr.bf16.mxu0 %v1744_v8 }
 0x13b   : > { %1503 = vmatpush3.bf16.msra.mxu1 %v1622_v44 }
 0x13c   : > { %1516 = vmatprep.subr.bf16.mxu1 %v1744_v8 }
 0x13d   : > { %1531 = vmatpush3.bf16.msra.mxu0 %v1628_v56 }
 0x13e   : > { %1505 = vmatmul.mubr.msk.bf16.vlgmr.msra.gmra.mrb[12].mxu1 %vm600_vm2, %v885_v48  ;;  %1532 = vmatprep.subr.bf16.mxu0 %v1744_v8 }
 0x13f   : > { %1517 = vmatpush3.bf16.msra.mxu1 %v1623_v47  ;;  %1520 = vmatprep.mubr.msk.bf16.mxu1 %vm1745_vm3, %v1744_v8  ;;  %v1411_v47 = vld [vmem:[%s2097_s6] ss:$0 sm:$0xff] }
 0x140   : > { %1518 = vmatprep.subr.bf16.mxu1 %v1744_v8 }
 0x141   : > { %1533 = vmatpush3.bf16.msra.mxu0 %v1629_v57 }
 0x142   : > { %1534 = vmatprep.subr.bf16.mxu0 %v1744_v8 }
 0x143   : > { %1519 = vmatpush3.bf16.msra.mxu1 %v1624_v49 }
 0x145   : > { %1535 = vmatpush3.bf16.msra.mxu0 %v1630_v58 }
 0x146   : > { %1521 = vmatmul.mubr.msk.bf16.vlgmr.msra.gmra.mrb[16].mxu1 %vm600_vm2, %v1025_v52 }
 0x1f9   : > { %v661_v59 = vpop.f32.mrb[0].mxu1 }
 0x1fa   : > { %v870_v60 = vpop.f32.mrb[4].mxu0  ;;  %669 = vst.msk [vmem:[#allocation3] sm:$0xff] %vm668_vm4, %v661_v59  ;;  %v1474_v61 = vpop.f32.mrb[1].mxu1 }
 0x1fb   : > { %v1498_v62 = vpop.f32.mrb[5].mxu0  ;;  %v664_v63 = vpop.f32.mrb[2].mxu1 }
 0x1fc   : > { %v873_v0 = vpop.f32.mrb[6].mxu0  ;;  %670 = vst.msk [vmem:[#allocation3 + $0x8] sm:$0xff] %vm668_vm4, %v664_v63  ;;  %v1475_v1 = vpop.f32.mrb[3].mxu1 }
 0x1fd   : > { %v1499_v2 = vpop.f32.mrb[7].mxu0 }
 0x201   : > { %v671_v3 = vld [vmem:[#allocation3] sm:$0xff]  ;;  %v730_v4 = vpop.f32.mrb[4].mxu1 }
 0x202   : > { %v1010_v5 = vpop.f32.mrb[8].mxu0  ;;  %v737_v6 = vadd.f32 %v730_v4, %v671_v3  ;;  %v1482_v7 = vpop.f32.mrb[5].mxu1 }
 0x203   : > { %v1514_v8 = vpop.f32.mrb[9].mxu0  ;;  %v672_v9 = vld [vmem:[#allocation3 + $0x8] sm:$0xff]  ;;  %v733_v10 = vpop.f32.mrb[6].mxu1 }
 0x204   : > { %v1013_v11 = vpop.f32.mrb[10].mxu0  ;;  %739 = vst.msk [vmem:[#allocation3] sm:$0xff] %vm668_vm4, %v737_v6  ;;  %v738_v12 = vadd.f32 %v733_v10, %v672_v9  ;;  %v1483_v13 = vpop.f32.mrb[7].mxu1 }
 0x205   : > { %v1515_v14 = vpop.f32.mrb[11].mxu0 }
 0x206   : > { %740 = vst.msk [vmem:[#allocation3 + $0x8] sm:$0xff] %vm668_vm4, %v738_v12 }
 0x209   : > { %v800_v15 = vpop.f32.mrb[8].mxu1 }
 0x20a   : > { %v1490_v16 = vpop.f32.mrb[9].mxu1 }
 0x20b   : > { %v741_v17 = vld [vmem:[#allocation3] sm:$0xff]  ;;  %v803_v18 = vpop.f32.mrb[10].mxu1 }
 0x20c   : > { %v807_v19 = vadd.f32 %v800_v15, %v741_v17  ;;  %v1491_v20 = vpop.f32.mrb[11].mxu1 }
 0x20d   : > { %v742_v21 = vld [vmem:[#allocation3 + $0x8] sm:$0xff] }
 0x20e   : > { %809 = vst.msk [vmem:[#allocation3] sm:$0xff] %vm668_vm4, %v807_v19  ;;  %v808_v22 = vadd.f32 %v803_v18, %v742_v21 }
 0x210   : > { %810 = vst.msk [vmem:[#allocation3 + $0x8] sm:$0xff] %vm668_vm4, %v808_v22 }
 0x211   : > { %v940_v23 = vpop.f32.mrb[12].mxu1 }
 0x212   : > { %v1506_v24 = vpop.f32.mrb[13].mxu1 }
 0x213   : > { %v943_v25 = vpop.f32.mrb[14].mxu1 }
 0x214   : > { %v1507_v26 = vpop.f32.mrb[15].mxu1 }
 0x215   : > { %v811_v27 = vld [vmem:[#allocation3] sm:$0xff] }
 0x216   : > { %v877_v28 = vadd.f32 %v870_v60, %v811_v27 }
 0x217   : > { %v812_v29 = vld [vmem:[#allocation3 + $0x8] sm:$0xff] }
 0x218   : > { %879 = vst.msk [vmem:[#allocation3] sm:$0xff] %vm668_vm4, %v877_v28  ;;  %v878_v30 = vadd.f32 %v873_v0, %v812_v29 }
 0x219   : > { %v1080_v31 = vpop.f32.mrb[16].mxu1 }
 0x21a   : > { %880 = vst.msk [vmem:[#allocation3 + $0x8] sm:$0xff] %vm668_vm4, %v878_v30  ;;  %v1522_v32 = vpop.f32.mrb[17].mxu1 }
 0x21b   : > { %v1083_v33 = vpop.f32.mrb[18].mxu1 }
 0x21c   : > { %v1523_v34 = vpop.f32.mrb[19].mxu1 }
 0x21f   : > { %v881_v35 = vld [vmem:[#allocation3] sm:$0xff] }
 0x220   : > { %v947_v36 = vadd.f32 %v940_v23, %v881_v35 }
 0x221   : > { %v882_v37 = vld [vmem:[#allocation3 + $0x8] sm:$0xff] }
 0x222   : > { %949 = vst.msk [vmem:[#allocation3] sm:$0xff] %vm668_vm4, %v947_v36  ;;  %v948_v38 = vadd.f32 %v943_v25, %v882_v37 }
 0x224   : > { %950 = vst.msk [vmem:[#allocation3 + $0x8] sm:$0xff] %vm668_vm4, %v948_v38 }
 0x229   : > { %v951_v39 = vld [vmem:[#allocation3] sm:$0xff] }
 0x22a   : > { %v1017_v40 = vadd.f32 %v1010_v5, %v951_v39 }
 0x22b   : > { %v952_v41 = vld [vmem:[#allocation3 + $0x8] sm:$0xff] }
 0x22c   : > { %1019 = vst.msk [vmem:[#allocation3] sm:$0xff] %vm668_vm4, %v1017_v40  ;;  %v1018_v42 = vadd.f32 %v1013_v11, %v952_v41 }
 0x22e   : > { %1020 = vst.msk [vmem:[#allocation3 + $0x8] sm:$0xff] %vm668_vm4, %v1018_v42 }
 0x233   : > { %v1021_v43 = vld [vmem:[#allocation3] sm:$0xff] }
 0x234   : > { %v1087_v44 = vadd.f32 %v1080_v31, %v1021_v43 }
 0x235   : > { %v1022_v45 = vld [vmem:[#allocation3 + $0x8] sm:$0xff] }
 0x236   : > { %1089 = vst.msk [vmem:[#allocation3] sm:$0xff] %vm668_vm4, %v1087_v44  ;;  %v1088_v46 = vadd.f32 %v1083_v33, %v1022_v45 }
 0x238   : > { %1090 = vst.msk [vmem:[#allocation3 + $0x8] sm:$0xff] %vm668_vm4, %v1088_v46 }
 0x23d   : > { %v1091_v48 = vld [vmem:[#allocation3] sm:$0xff] }
 0x23e   : > { %v1100_v49 = vadd.f32 %v1411_v47, %v1091_v48 }
 0x23f   : > { %v1092_v50 = vld [vmem:[#allocation3 + $0x8] sm:$0xff] }
 0x240   : > { %v1101_v51 = vadd.f32 %v1411_v47, %v1092_v50  ;;  %v1102_v52 = vmax.f32 %v1100_v49, 0.0 }
 0x242   : > { %v1103_v53 = vmax.f32 %v1101_v51, 0.0 }
 0x244   : > { %v1104_v54 = vpack.c.bf16 %v1103_v53, %v1102_v52 }
 0x246   : > { %1537 = vmatmul.mubr.msk.bf16.vlgmr.msra.gmra.mrb[12].mxu0 %vm668_vm4, %v1104_v54 }
 0x319   : > { %v1197_v56 = vpop.f32.mrb[12].mxu0 }
 0x31a   : > { %v1198_v57 = vadd.f32 %v1412_v55, %v1197_v56  ;;  %v1538_v58 = vpop.f32.mrb[13].mxu0 }
 0x31b   : > { %v1200_v59 = vpop.f32.mrb[14].mxu0 }
 0x31c   : > { %1204 = vst [vmem:[%s449_s17] sm:$0xff] %v1198_v57  ;;  %v1201_v60 = vadd.f32 %v1412_v55, %v1200_v59  ;;  %v1539_v61 = vpop.f32.mrb[15].mxu0 }
 0x31e   : > { %1205 = vst [vmem:[%s449_s17 + $0x8] sm:$0xff] %v1201_v60 }
 0x31f   : > { %1672 = shalt.err (!%p1669_p6)
}
 0x320   : > { %s1673_s25 = scalar_lea.hbm %s2043_s26, 256  ;;  %s1677_s27 = scalar_lea.hbm %s2100_s9, 512 }
 0x321   : > { %p1674_p7 = scmp.ne.s32.totalorder %s2043_s26, %s1673_s25  ;;  %p1678_p0 = scmp.lt.u32.totalorder %s2043_s26, %s2100_s9 }
 0x322   : > { %p1679_p2 = scmp.lt.u32.totalorder %s1677_s27, %s1673_s25  ;;  %p1681_p8 = scmp.lt.u32.totalorder %s1673_s25, %s2043_s26 }
 0x323   : > { %p1675_p9 = pnand %p1674_p7, %p2114_p10 }
 0x324   : > { %p1680_p4 = por %p1679_p2, %p1678_p0 }
 0x325   : > { %p1676_p12 = pneg %p1675_p9 }
 0x326   : > { %p1682_p11 = por %p1681_p8, %p1680_p4 }
 0x328   : > { %p1683_p13 = pnand %p1682_p11, %p1676_p12 }
 0x32a   : > { %1686 = shalt.err (!%p1683_p13)
}
 0x32b   : > { %s1747_s12 = smov 128   ;;  %s1748_s23 = smov 8  }
 0x32c   : > { %1545 = dma.vmem_to_hbm [thread:$0]  (%p2114_p10), %s2038_s16, 256, %s2043_s26, %s2045_s20, %s1747_s12, %s1747_s12, %s1748_s23  }
 0x32d PF: > { %p1557_p1 = scmp.ge.s32.totalorder %s1741_s14, 2  ;;  %s1237_s28 = sand.u32 1, %s1721_s30  }
 0x32e   : > { %p2115_p3 = scmp.ne.s32.totalorder %s2108_s21, 0  ;;  %s1238_s29 = scalar_lea.sflag [#allocation6], %s1237_s28 }
 0x330   : > { %p1552_p5 = pnand %p1557_p1, %p2115_p3 }
 0x332   : > { %1716 = dma.done.wait (!%p1552_p5), %s1238_s29, 256  }
 0x333   : > { %1718 = vsyncadd (!%p1552_p5), %s1238_s29, 4294967040  ;;  %s23_s14 = sadd.s32 1, %s1741_s14   ;;  %s2116_s19 = sld [smem:[#allocation10_spill]] }
 0x334   : > { %p20_p6 = scmp.ge.s32.totalorder %s23_s14, 4   ;;  %s2117_s30 = smov %s1725_s10 }
 0x335   : > { %s2118_s10 = smov %s1729_s11  ;;  %s2119_s11 = smov %s1852_s22 }
 0x336   : > { %s2120_s12 = smov %s1737_s13  ;;  %22 = sbr.rel (!%p20_p6) target bundleno = 5 (0x5), region = 108 }
 0x339   : > { %s2121_s13 = smov %s2116_s19 }
 0x33d   :  { %1243 = vsyncpa [#allocation5], 1 }
 0x33e   :  { %1245 = vsyncpa [#allocation5 + $0x1], 1 }
 0x33f   :  { %1246 = vsyncpa [#allocation6], 1 }
 0x340   :  { %1248 = vsyncpa [#allocation6 + $0x1], 1 }

</bundles_post_ra>
